<compile_context>
chip_gen: v5e
topology: v5e:2x2
jax: 0.10.0
libtpu: 0.0.40
codegen_flags: <defaults>
</compile_context>

<pallas_src>
import jax
import jax.numpy as jnp
from jax.experimental import pallas as pl
from jax.experimental.pallas import tpu as pltpu


# --------------------------------------------------------------------------
# Kernels
# --------------------------------------------------------------------------
def _alias_identity_kernel(x_ref, o_ref):
    # forward() is identity and o_ref is aliased to x_ref's HBM buffer, so the
    # output already holds the correct bytes: no DMA, no compute needed.
    del x_ref, o_ref


def _copy_kernel(x_ref, o_ref):
    # Explicit tiled copy (fallback for callers that cannot donate/alias x).
    o_ref[...] = x_ref[...]


# --------------------------------------------------------------------------
# Tiling helpers (copy path only)
# --------------------------------------------------------------------------
_LANE_CANDIDATES = (2048, 1024, 512, 256, 128)
_TILE_BYTES = 8 * 1024 * 1024        # ~8 MiB blocks: near HBM roofline
_VMEM_LIMIT = 48 * 1024 * 1024       # < v7x 64 MiB physical, > v5e/v6e defaults


def _lane_dense_view(shape):
    """2-D (rows, lanes) view of a contiguous array, with lanes a large
    multiple of 128 when possible (unmasked full-lane-width vector stores)."""
    total = 1
    for s in shape:
        total *= int(s)
    if total % 128 == 0:
        for lanes in _LANE_CANDIDATES:            # widest first
            if total % lanes == 0 and total // lanes >= 8:
                return (total // lanes, lanes)
        return (total // 128, 128)
    # Not cleanly lane-reshapeable: keep a (leading, last) 2-D view.
    if len(shape) == 1:
        return (1, int(shape[0]))
    lead = 1
    for s in shape[:-1]:
        lead *= int(s)
    return (lead, int(shape[-1]))


def _pick_tile_rows(rows, row_bytes):
    """Largest multiple-of-8 row tile within the ~8 MiB byte budget; keep
    >= 2 grid steps when there is enough work (v7x has 2 TensorCores)."""
    if rows <= 8:
        return rows                                # full extent is always legal
    budget = max(8, (_TILE_BYTES // max(1, row_bytes)) // 8 * 8)
    if rows > budget:
        return budget
    if rows >= 16:                                 # split so grid >= 2 (megacore)
        half = (rows + 1) // 2
        return max(8, (half + 7) // 8 * 8)
    return rows


# --------------------------------------------------------------------------
# Forward pass
# --------------------------------------------------------------------------
def _identity_alias(x):
    """Zero-DMA identity: output HBM buffer aliased to the input buffer."""
    return pl.pallas_call(
        _alias_identity_kernel,
        out_shape=jax.ShapeDtypeStruct(x.shape, x.dtype),
        in_specs=[pl.BlockSpec(memory_space=pl.ANY)],
        out_specs=pl.BlockSpec(memory_space=pl.ANY),
        input_output_aliases={0: 0},   # output buffer == (donated) input buffer
    )(x)


def _identity_copy(x):
    """Explicit tiled copy through VMEM (no aliasing), lane-dense layout."""
    rows, lanes = _lane_dense_view(x.shape)
    xv = x.reshape((rows, lanes))      # free at XLA level for contiguous arrays
    itemsize = jnp.dtype(x.dtype).itemsize
    tile_rows = _pick_tile_rows(rows, lanes * itemsize)
    grid = (pl.cdiv(rows, tile_rows),)

    yv = pl.pallas_call(
        _copy_kernel,
        out_shape=jax.ShapeDtypeStruct((rows, lanes), x.dtype),
        grid=grid,
        in_specs=[pl.BlockSpec((tile_rows, lanes), lambda i: (i, 0))],
        out_specs=pl.BlockSpec((tile_rows, lanes), lambda i: (i, 0)),
        compiler_params=pltpu.CompilerParams(
            dimension_semantics=("parallel",),   # shard row tiles across TCs (v7x)
            vmem_limit_bytes=_VMEM_LIMIT,
        ),
    )(xv)
    return yv.reshape(x.shape)


def prediction_mlp_forward(x, *, donate=True):
    """Pallas implementation of prediction_MLP.forward: returns x unchanged.

    donate=True  -> aliased zero-DMA kernel (caller should donate x under jit).
    donate=False -> explicit tiled lane-dense copy (no aliasing)."""
    if donate:
        return _identity_alias(x)
    return _identity_copy(x)


# --------------------------------------------------------------------------
# Parameter init mirroring the module's __init__ (NOT used by forward()).
# --------------------------------------------------------------------------
def init_prediction_mlp_params(key, in_dim=256, hidden_dim=256, out_dim=256,
                               dtype=jnp.float32):
    # TODO(synk): if the spec's forward ever becomes layer2(layer1(x)) (the
    # usual SimSiam h-MLP), replace the identity kernel with a fused
    # Linear->BN->ReLU->Linear MXU kernel keeping W1/W2 resident in VMEM.
    k1, k2 = jax.random.split(key, 2)
    return {
        "layer1_linear_w": jax.random.normal(k1, (hidden_dim, in_dim), dtype) * 0.02,
        "layer1_linear_b": jnp.zeros((hidden_dim,), dtype),
        "layer1_bn_gamma": jnp.ones((hidden_dim,), dtype),
        "layer1_bn_beta": jnp.zeros((hidden_dim,), dtype),
        "layer1_bn_mean": jnp.zeros((hidden_dim,), dtype),
        "layer1_bn_var": jnp.ones((hidden_dim,), dtype),
        "layer2_w": jax.random.normal(k2, (out_dim, hidden_dim), dtype) * 0.02,
        "layer2_b": jnp.zeros((out_dim,), dtype),
    }


if __name__ == "__main__":
    key = jax.random.PRNGKey(0)
    in_dim = hidden_dim = out_dim = 32
    batch = 32

    # Parameters mirror the module's structure but are unused by forward().
    params = init_prediction_mlp_params(key, in_dim, hidden_dim, out_dim)

    x = jax.random.normal(jax.random.PRNGKey(0), (batch, in_dim), jnp.float32)

    # 1) Primary path: aliased, zero-DMA identity kernel (eager call; XLA
    #    inserts one defensive copy since x is not donated here).
    y = prediction_mlp_forward(x)
    jax.block_until_ready(y)
    assert y.shape == x.shape and y.dtype == x.dtype
    assert jnp.allclose(y, x)

    # 2) Intended production usage: jitted with the input donated -> the
    #    aliased output reuses x's HBM buffer, no copy at all.
    donated_fwd = jax.jit(prediction_mlp_forward, donate_argnums=0)
    x_donated = x + 0.0                      # separate buffer we may donate
    y_donated = donated_fwd(x_donated)
    jax.block_until_ready(y_donated)
    assert jnp.allclose(y_donated, x)

    # 3) Explicit-copy fallback: exercises the lane-dense (8, 128) view and
    #    the byte-budgeted tiled copy pipeline.
    y_copy = prediction_mlp_forward(x, donate=False)
    jax.block_until_ready(y_copy)
    assert y_copy.shape == x.shape and y_copy.dtype == x.dtype
    assert jnp.allclose(y_copy, x)

    print("KERNEL_OK")
</pallas_src>

<mosaic_0001>
module attributes {stable_mosaic.version = 11 : i64} {
  func.func @_alias_identity_kernel(%arg0: memref<32x32xf32, #tpu.memory_space<any>>, %arg1: memref<32x32xf32, #tpu.memory_space<any>>) attributes {dimension_semantics = [], scalar_prefetch = 0 : i64, scratch_operands = 0 : i64, tpu.core_type = #tpu.core_type<tc>} {
    return
  }
}

</mosaic_0001>

<bundles_post_ra>
// kernel: tpu_custom_call.1
= control target key start
LH: loop header
LB: loop body
LE: loop exit
PB: predicated region body
PF: predicated region fallthrough
CT: control target
= control target key end

     0   :  { %s16_s0 = inlined_call_operand.hbm [shape: f32[32,32], index: 0, kind: input, shape index: {}, may-alias: {0,1}]   ;;  %s17_s1 = inlined_call_operand.hbm [shape: f32[32,32], index: 1, kind: output, shape index: {}, may-alias: {0,1}]  }

</bundles_post_ra>
